<compile_context>
chip_gen: v7x
topology: tpu7x:2x2x1
jax: 0.10.0
libtpu: 0.0.40
codegen_flags: <defaults>
</compile_context>

<pallas_src>
import jax
import jax.numpy as jnp
from jax.experimental import pallas as pl
from jax.experimental.pallas import tpu as pltpu


def se_kernel(x_ref, w1t_ref, b1_ref, w2t_ref, b2_ref, o_ref):
    # x_ref block: (1, C, HW)
    x = x_ref[0]                                           # (C, HW), input dtype

    # Squeeze: global average pool over spatial positions (lane reduction).
    # Accumulate in f32; the cast fuses into the reduction (no f32 slab temp).
    pooled = jnp.mean(x.astype(jnp.float32), axis=-1, keepdims=True)   # (C, 1)

    # Excitation: fc1 + ReLU -> fc2 + sigmoid (tiny, kept in f32).
    h = jnp.dot(w1t_ref[...], pooled, preferred_element_type=jnp.float32)
    h = jnp.maximum(h + b1_ref[...], 0.0)                  # (Cr, 1)
    g = jnp.dot(w2t_ref[...], h, preferred_element_type=jnp.float32)
    g = jax.nn.sigmoid(g + b2_ref[...])                    # (C, 1)

    # Scale: gate broadcasts over lanes; multiply in input dtype,
    # lane-dense store (HW on lanes).
    o_ref[0] = x * g.astype(x.dtype)


def se_block(x, w1, b1, w2, b2):
    """x: (B, C, H, W) NCHW.  w1: (C, Cr), b1: (Cr,), w2: (Cr, C), b2: (C,)."""
    B, C, H, W = x.shape
    Cr = w1.shape[1]
    HW = H * W

    # Free reshapes / tiny one-time weight transposes (no full-tensor transpose).
    xr = x.reshape(B, C, HW)          # NCHW contiguous -> (B, C, HW), no copy
    w1t = w1.T                        # (Cr, C)
    w2t = w2.T                        # (C, Cr)
    b1c = b1.reshape(Cr, 1)
    b2c = b2.reshape(C, 1)

    itemsize = jnp.dtype(x.dtype).itemsize
    slab_bytes = C * HW * itemsize
    # Double-buffered input + double-buffered output + weights + headroom.
    weights_bytes = (w1.size + b1.size + w2.size + b2.size) * 4
    vmem_needed = 4 * slab_bytes + weights_bytes + (1 << 20)
    # Keep within the smallest per-generation budget (v7x: 64 MiB physical,
    # v5e: 16 MiB default scoped) while guaranteeing enough for the pipeline.
    vmem_limit = int(min(max(vmem_needed, 16 << 20), 48 << 20))
    # NOTE: for very large feature maps (4*slab > ~48 MiB) this whole-slab
    # single-pass design should be replaced by an HW-tiled two-phase kernel
    # (pool-accumulate across HW tiles, then scale).

    # Bandwidth-bound custom call: ~2 passes over x, negligible FLOPs.
    cost = pl.CostEstimate(
        flops=int(B * (HW * C + 4 * C * Cr)),
        transcendentals=int(B * C),
        bytes_accessed=int(2 * B * HW * C * itemsize),
    )

    out = pl.pallas_call(
        se_kernel,
        out_shape=jax.ShapeDtypeStruct((B, C, HW), x.dtype),
        grid=(B,),
        in_specs=[
            pl.BlockSpec((1, C, HW), lambda b: (b, 0, 0)),
            pl.BlockSpec((Cr, C), lambda b: (0, 0)),
            pl.BlockSpec((Cr, 1), lambda b: (0, 0)),
            pl.BlockSpec((C, Cr), lambda b: (0, 0)),
            pl.BlockSpec((C, 1), lambda b: (0, 0)),
        ],
        out_specs=pl.BlockSpec((1, C, HW), lambda b: (b, 0, 0)),
        compiler_params=pltpu.CompilerParams(
            dimension_semantics=("parallel",),
            vmem_limit_bytes=vmem_limit),
        cost_estimate=cost,
    )(xr, w1t, b1c, w2t, b2c)

    return out.reshape(B, C, H, W)    # free reshape back to NCHW


def se_block_ref(x, w1, b1, w2, b2):
    """Pure-JAX reference matching the PyTorch forward."""
    pooled = jnp.mean(x, axis=(2, 3))                      # (B, C)
    h = jax.nn.relu(pooled @ w1 + b1)                      # (B, Cr)
    g = jax.nn.sigmoid(h @ w2 + b2)                        # (B, C)
    return x * g[:, :, None, None]


if __name__ == "__main__":
    # Small shapes consistent with SEBlock(n_channels=64, reduction=16)
    B, C, H, W = 2, 64, 16, 16
    reduction = 16
    Cr = C // reduction

    key = jax.random.PRNGKey(0)
    kx, k1, k2, k3, k4 = jax.random.split(key, 5)

    x = jax.random.normal(kx, (B, C, H, W), dtype=jnp.float32)

    # Deterministic parameter init (mimic nn.Linear uniform(-1/sqrt(fan_in), ...))
    bound1 = 1.0 / (C ** 0.5)
    bound2 = 1.0 / (Cr ** 0.5)
    # Note: PyTorch Linear weight is (out, in); we store (in, out) for x @ W.
    w1 = jax.random.uniform(k1, (C, Cr), jnp.float32, -bound1, bound1)
    b1 = jax.random.uniform(k2, (Cr,), jnp.float32, -bound1, bound1)
    w2 = jax.random.uniform(k3, (Cr, C), jnp.float32, -bound2, bound2)
    b2 = jax.random.uniform(k4, (C,), jnp.float32, -bound2, bound2)

    out = se_block(x, w1, b1, w2, b2)
    out = jax.block_until_ready(out)

    ref = se_block_ref(x, w1, b1, w2, b2)
    assert out.shape == (B, C, H, W)
    assert jnp.allclose(out, ref, atol=1e-5, rtol=1e-5), "mismatch vs reference"

    print("KERNEL_OK")
</pallas_src>

<mosaic_0001>
module attributes {stable_mosaic.version = 11 : i64} {
  func.func @se_kernel(%arg0: i32, %arg1: memref<1x64x256xf32, #tpu.memory_space<vmem>>, %arg2: memref<4x64xf32, #tpu.memory_space<vmem>>, %arg3: memref<4x1xf32, #tpu.memory_space<vmem>>, %arg4: memref<64x4xf32, #tpu.memory_space<vmem>>, %arg5: memref<64x1xf32, #tpu.memory_space<vmem>>, %arg6: memref<1x64x256xf32, #tpu.memory_space<vmem>>) attributes {dimension_semantics = [#tpu.dimension_semantics<parallel>], iteration_bounds = array<i64: 2>, scalar_prefetch = 0 : i64, scratch_operands = 0 : i64, tpu.core_type = #tpu.core_type<tc>, window_params = [{transform_indices = @transform_0, window_bounds = array<i64: 1, 64, 256>}, {pipeline_mode = #tpu.pipeline_mode<synchronous>, transform_indices = @transform_1, window_bounds = array<i64: 4, 64>}, {pipeline_mode = #tpu.pipeline_mode<synchronous>, transform_indices = @transform_2, window_bounds = array<i64: 4, 1>}, {pipeline_mode = #tpu.pipeline_mode<synchronous>, transform_indices = @transform_3, window_bounds = array<i64: 64, 4>}, {pipeline_mode = #tpu.pipeline_mode<synchronous>, transform_indices = @transform_4, window_bounds = array<i64: 64, 1>}, {transform_indices = @transform_5, window_bounds = array<i64: 1, 64, 256>}]} {
    %c0 = arith.constant 0 : index
    %c0_0 = arith.constant 0 : index
    %c0_1 = arith.constant 0 : index
    %0 = vector.load %arg1[%c0, %c0_0, %c0_1] : memref<1x64x256xf32, #tpu.memory_space<vmem>>, vector<1x64x256xf32>
    %1 = vector.shape_cast %0 : vector<1x64x256xf32> to vector<64x256xf32>
    %cst = arith.constant dense<0.000000e+00> : vector<64xf32>
    %2 = vector.multi_reduction <add>, %1, %cst [1] : vector<64x256xf32> to vector<64xf32>
    %3 = vector.shape_cast %2 : vector<64xf32> to vector<64x1xf32>
    %cst_2 = arith.constant 2.560000e+02 : f32
    %4 = vector.broadcast %cst_2 : f32 to vector<64x1xf32>
    %5 = arith.divf %3, %4 : vector<64x1xf32>
    %c0_3 = arith.constant 0 : index
    %c0_4 = arith.constant 0 : index
    %6 = vector.load %arg2[%c0_3, %c0_4] : memref<4x64xf32, #tpu.memory_space<vmem>>, vector<4x64xf32>
    %cst_5 = arith.constant dense<0.000000e+00> : vector<4x1xf32>
    %7 = tpu.matmul %6, %5, %cst_5 {dimension_numbers = #tpu.dot_dimension_numbers<[1], [0], [0], [1], [0, 0, 1, 1], [], []>} : vector<4x64xf32>, vector<64x1xf32>, vector<4x1xf32> -> vector<4x1xf32>
    %c0_6 = arith.constant 0 : index
    %c0_7 = arith.constant 0 : index
    %8 = vector.load %arg3[%c0_6, %c0_7] : memref<4x1xf32, #tpu.memory_space<vmem>>, vector<4x1xf32>
    %9 = arith.addf %7, %8 : vector<4x1xf32>
    %cst_8 = arith.constant 0.000000e+00 : f32
    %10 = vector.broadcast %cst_8 : f32 to vector<4x1xf32>
    %11 = arith.maximumf %9, %10 : vector<4x1xf32>
    %c0_9 = arith.constant 0 : index
    %c0_10 = arith.constant 0 : index
    %12 = vector.load %arg4[%c0_9, %c0_10] : memref<64x4xf32, #tpu.memory_space<vmem>>, vector<64x4xf32>
    %cst_11 = arith.constant dense<0.000000e+00> : vector<64x1xf32>
    %13 = tpu.matmul %12, %11, %cst_11 {dimension_numbers = #tpu.dot_dimension_numbers<[1], [0], [0], [1], [0, 0, 1, 1], [], []>} : vector<64x4xf32>, vector<4x1xf32>, vector<64x1xf32> -> vector<64x1xf32>
    %c0_12 = arith.constant 0 : index
    %c0_13 = arith.constant 0 : index
    %14 = vector.load %arg5[%c0_12, %c0_13] : memref<64x1xf32, #tpu.memory_space<vmem>>, vector<64x1xf32>
    %15 = arith.addf %13, %14 : vector<64x1xf32>
    %16 = arith.negf %15 : vector<64x1xf32>
    %17 = math.exp %16 : vector<64x1xf32>
    %cst_14 = arith.constant 1.000000e+00 : f32
    %18 = vector.broadcast %cst_14 : f32 to vector<64x1xf32>
    %19 = arith.addf %18, %17 : vector<64x1xf32>
    %20 = arith.divf %18, %19 : vector<64x1xf32>
    %21 = vector.broadcast %20 : vector<64x1xf32> to vector<64x256xf32>
    %22 = arith.mulf %1, %21 : vector<64x256xf32>
    %c0_15 = arith.constant 0 : index
    %c0_16 = arith.constant 0 : index
    %c0_17 = arith.constant 0 : index
    %23 = vector.load %arg6[%c0_15, %c0_16, %c0_17] : memref<1x64x256xf32, #tpu.memory_space<vmem>>, vector<1x64x256xf32>
    %24 = vector.shape_cast %23 : vector<1x64x256xf32> to vector<64x256xf32>
    %25 = vector.shape_cast %22 : vector<64x256xf32> to vector<1x64x256xf32>
    tpu.vector_store %arg6[%c0_15, %c0_16, %c0_17], %25 {strides = array<i32>} : memref<1x64x256xf32, #tpu.memory_space<vmem>>, vector<1x64x256xf32>,
    return
  }
  func.func @transform_0(%arg0: i32) -> (i32, i32, i32) {
    %c0_i32 = arith.constant 0 : i32
    %c0_i32_0 = arith.constant 0 : i32
    %c0_i32_1 = arith.constant 0 : i32
    return %arg0, %c0_i32, %c0_i32_0 : i32, i32, i32
  }
  func.func @transform_1(%arg0: i32) -> (i32, i32) {
    %c0_i32 = arith.constant 0 : i32
    %c0_i32_0 = arith.constant 0 : i32
    %c0_i32_1 = arith.constant 0 : i32
    return %c0_i32, %c0_i32_0 : i32, i32
  }
  func.func @transform_2(%arg0: i32) -> (i32, i32) {
    %c0_i32 = arith.constant 0 : i32
    %c0_i32_0 = arith.constant 0 : i32
    %c0_i32_1 = arith.constant 0 : i32
    return %c0_i32, %c0_i32_0 : i32, i32
  }
  func.func @transform_3(%arg0: i32) -> (i32, i32) {
    %c0_i32 = arith.constant 0 : i32
    %c0_i32_0 = arith.constant 0 : i32
    %c0_i32_1 = arith.constant 0 : i32
    return %c0_i32, %c0_i32_0 : i32, i32
  }
  func.func @transform_4(%arg0: i32) -> (i32, i32) {
    %c0_i32 = arith.constant 0 : i32
    %c0_i32_0 = arith.constant 0 : i32
    %c0_i32_1 = arith.constant 0 : i32
    return %c0_i32, %c0_i32_0 : i32, i32
  }
  func.func @transform_5(%arg0: i32) -> (i32, i32, i32) {
    %c0_i32 = arith.constant 0 : i32
    %c0_i32_0 = arith.constant 0 : i32
    %c0_i32_1 = arith.constant 0 : i32
    return %arg0, %c0_i32, %c0_i32_0 : i32, i32, i32
  }
}

</mosaic_0001>

<bundles_post_ra>
// kernel: tpu_custom_call.1
= control target key start
LH: loop header
LB: loop body
LE: loop exit
PB: predicated region body
PF: predicated region fallthrough
CT: control target
= control target key end

     0   :  { %10 = vsyncpa [#allocation3], 0  ;;  %s1360_s0 = inlined_call_operand.hbm [shape: f32[2,64,256], index: 0, kind: input, shape index: {}]   ;;  %s1361_s1 = inlined_call_operand.vmem [shape: f32[4,64], index: 1, kind: input, shape index: {}]   ;;  %s1362_s2 = inlined_call_operand.vmem [shape: f32[4,1], index: 2, kind: input, shape index: {}]   ;;  %s1363_s3 = inlined_call_operand.vmem [shape: f32[64,4], index: 3, kind: input, shape index: {}]   ;;  %s1364_s4 = inlined_call_operand.vmem [shape: f32[64,1], index: 4, kind: input, shape index: {}]   ;;  %s1365_s5 = inlined_call_operand.hbm [shape: f32[2,64,256], index: 5, kind: output, shape index: {}]  }
   0x1   :  { %12 = vsyncpa [#allocation3 + $0x1], 0 }
   0x2   :  { %13 = vsyncpa [#allocation4], 0 }
   0x3   :  { %15 = vsyncpa [#allocation4 + $0x1], 0  ;;  %s1049_s18 = smov 0   ;;  %s1051_s19 = smov 0  }
   0x4   :  { %s1053_s20 = smov 0   ;;  %s1055_s21 = smov 0  }
   0x5 LB: > { %s1070_s22 = sadd.s32 4294967295, %s1007_s21   ;;  %s726_s23 = sadd.s32 4294967294, %s1007_s21   ;;  %s1007_s21 = sphi %s1055_s21, %s1378_s21   ;;  %s1003_s20 = sphi %s1053_s20, %s1377_s20   ;;  %s999_s19 = sphi %s1051_s19, %s1376_s19   ;;  %s995_s18 = sphi %s1049_s18, %s1375_s18  }
   0x6   : > { %s1074_s24 = sadd.s32 1, %s1007_s21   ;;  %s28_s25 = sadd.s32 1, %s1003_s20 }
   0x7   : > { %s25_s26 = ssub.s32 %s1007_s21, %s1074_s24  ;;  %p35_p0 = scmp.ne.s32.totalorder %s1003_s20, %s999_s19 }
   0x8   : > { %p26_p1 = scmp.eq.s32.totalorder %s25_s26, 0  ;;  %p36_p2 = scmp.eq.s32.totalorder %s1007_s21, 0 }
   0x9   : > { %p41_p3 = scmp.ne.s32.totalorder %s999_s19, %s995_s18  ;;  %p42_p4 = scmp.eq.s32.totalorder %s1070_s22, 0 }
   0xa   : > { %s1086_s27 = scalar_select %p26_p1, %s1003_s20, %s28_s25  }
   0xb   : > { %p1088_p5 = por %p36_p2, %p35_p0  ;;  %p1092_p6 = por %p42_p4, %p41_p3 }
   0xc   : > { %p149_p7 = scmp.eq.s32.totalorder %s1070_s22, 1  ;;  %p155_p8 = scmp.eq.s32.totalorder %s726_s23, 1 }
   0xd   : > { %p835_p10 = scmp.lt.s32.totalorder %s1007_s21, 2  ;;  %s187_s7 = sand.u32 1, %s1003_s20  }
   0xe   : > { %p1099_p11 = por %p149_p7, %p35_p0  ;;  %p1103_p12 = por %p155_p8, %p41_p3 }
   0xf   : > { %s758_s8 = sshll.u32 %s1007_s21, 11  ;;  %s729_s9 = sshll.u32 %s187_s7, 7 }
  0x10   : > { %s1369_s30 = scalar_select %p1099_p11, 1, 0 }
  0x11   : > { %s1370_s6 = scalar_select %p1103_p12, 1, 0 }
  0x12   : > { %s1112_s12 = scalar_lea.hbm %s1360_s0, %s758_s8  ;;  %s191_s13 = scalar_lea.vmem [#allocation2], %s729_s9 }
  0x13   : > { %s198_s14 = sshll.u32 %s191_s13, 4  ;;  %p1116_p13 = pnand %p835_p10, %p1088_p5  ;;  %s1120_s14 = int_to_ptr.vmem [resolvable:$true] %s198_s14 }
  0x14   : > { %s1122_s16 = scalar_lea.sflag [#allocation3], %s187_s7  ;;  %s911_s17 = scalar_lea.hbm %s1112_s12, 2048 }
  0x15   : > { %p912_p0 = scmp.ne.s32.totalorder %s1112_s12, %s911_s17  ;;  %p913_p1 = pneg %p1116_p13 }
  0x16   : > { %s916_s26 = scalar_lea.hbm %s1360_s0, 4096  ;;  %p917_p4 = scmp.lt.u32.totalorder %s1112_s12, %s1360_s0 }
  0x17   : > { %p914_p2 = pnand %p913_p1, %p912_p0  ;;  %p918_p5 = scmp.lt.u32.totalorder %s916_s26, %s911_s17 }
  0x18   : > { %p920_p8 = scmp.lt.u32.totalorder %s911_s17, %s1112_s12 }
  0x19   : > { %p915_p3 = pneg %p914_p2  ;;  %p919_p7 = por %p918_p5, %p917_p4 }
  0x1b   : > { %p921_p10 = por %p920_p8, %p919_p7 }
  0x1d   : > { %p922_p9 = pnand %p921_p10, %p915_p3 }
  0x1f   : > { %925 = shalt.err (!%p922_p9)
}
  0x20   : > { %s926_s7 = scalar_lea.vmem %s1120_s14, 2048  ;;  %s1009_s9 = smov [#allocation2]  }
  0x21   : > { %p927_p0 = scmp.ne.s32.totalorder %s1120_s14, %s926_s7  ;;  %s931_s10 = sshll.u32 %s1009_s9, 4  ;;  %s932_s10 = int_to_ptr.vmem [resolvable:$false] %s931_s10 }
  0x22   : > { %s933_s11 = scalar_lea.vmem %s932_s10, 4096  ;;  %p934_p11 = scmp.lt.s32.totalorder %s1120_s14, %s932_s10 }
  0x23   : > { %p929_p2 = pnand %p927_p0, %p913_p1  ;;  %p935_p4 = scmp.lt.s32.totalorder %s933_s11, %s926_s7 }
  0x25   : > { %p930_p12 = pneg %p929_p2  ;;  %p936_p5 = por %p935_p4, %p934_p11 }
  0x27   : > { %p937_p7 = pnand %p936_p5, %p930_p12 }
  0x29   : > { %940 = shalt.err (!%p937_p7)
}
  0x2a   : > { %s1010_s13 = smov 256   ;;  %s1011_s17 = smov 16  }
  0x2b   : > { %830 = dma.hbm_to_vmem [thread:$0]  (!%p1116_p13), %s1112_s12, 2048, %s1120_s14, %s1122_s16, %s1010_s13, %s1010_s13, %s1011_s17  }
  0x2c   : > { %p732_p9 = scmp.ge.s32.totalorder %s1007_s21, 1  ;;  %p206_p1 = scmp.lt.s32.totalorder %s1007_s21, 3 }
  0x2e   : > { %p207_p3 = pnand %p732_p9, %p206_p1 }
  0x2f   : > { %s1153_s23 = sand.u32 (!%p207_p3), 1, %s999_s19  }
  0x30   : > { %210 = sbr.rel (%p207_p3) target bundleno = 852 (0x354), region = 40  ;;  %s733_s25 = sshll.u32 (!%p207_p3), %s1153_s23, 7 }
  0x31   : > { %s213_s26 = scalar_lea.sflag (!%p207_p3), [#allocation3], %s1153_s23  ;;  %s216_s28 = scalar_lea.vmem (!%p207_p3), [#allocation2], %s733_s25 }
  0x37   : > { %986 = dma.done.wait (%p1092_p6), %s213_s26, 2048  }
  0x38   : > { %988 = vsyncadd (%p1092_p6), %s213_s26, 4294965248  ;;  %v1163_v0 = vld [vmem:[%s216_s28 + $0x20] sm:$0xff]  ;;  %v1165_v1 = vld [vmem:[%s216_s28 + $0x28] sm:$0xff]  ;;  %v1012_v24 = vmov 0.0|0.0   ;;  %vm1013_vm0 = vmmov 0   ;;  %v1014_v25 = vmov 0.0  }
  0x39   : > { %v1167_v2 = vld [vmem:[%s216_s28] sm:$0xff]  ;;  %v265_v3 = vadd.f32 %v1165_v1, %v1163_v0  ;;  %v1171_v4 = vld [vmem:[%s216_s28 + $0x8] sm:$0xff]  ;;  %v1173_v5 = vld [vmem:[%s216_s28 + $0x30] sm:$0xff]  ;;  %811 = vmatprep.subr.bf16.mxu0 %v1012_v24  ;;  %794 = vmatprep.mubr.msk.f32.mxu0 %vm1013_vm0, %v1014_v25  ;;  %vm294_vm1 = vcmask 523264   ;;  %vm385_vm2 = vcmask 31744   ;;  %vm410_vm3 = vcmask 1043456  }
  0x3a   : > { %v1175_v6 = vld [vmem:[%s216_s28 + $0x38] sm:$0xff]  ;;  %v259_v7 = vadd.f32 %v1171_v4, %v1167_v2  ;;  %v1179_v8 = vld [vmem:[%s216_s28 + $0x10] sm:$0xff]  ;;  %v1191_v14 = vld [vmem:[%s216_s28 + $0x40] sm:$0xff]  ;;  %v1015_v60 = vmov 0   ;;  %s1279_s10 = scalar_lea.vmem [#allocation5], %s733_s25  ;;  %s759_s25 = sshll.u32 %s1070_s22, 11 }
  0x3b   : > { %v1181_v9 = vld [vmem:[%s216_s28 + $0x18] sm:$0xff]  ;;  %266 = vadd.xlane.f32.xlu1 %v265_v3  ;;  %v268_v10 = vadd.f32 %v1175_v6, %v1173_v5  ;;  %v1187_v12 = vld [vmem:[%s216_s28 + $0x50] sm:$0xff]  ;;  %v1193_v15 = vld [vmem:[%s216_s28 + $0x48] sm:$0xff]  ;;  %877 = vset.pattern.permute.xlu0 %v1015_v60  ;;  %s653_s11 = sshll.u32 %s1279_s10, 4  ;;  %s1310_s26 = scalar_lea.hbm %s1365_s5, %s759_s25  ;;  %s1312_s11 = int_to_ptr.vmem [resolvable:$true] %s653_s11 }
  0x3c   : > { %260 = vadd.xlane.f32.xlu0 %v259_v7  ;;  %v262_v11 = vadd.f32 %v1181_v9, %v1179_v8  ;;  %v1189_v13 = vld [vmem:[%s216_s28 + $0x58] sm:$0xff]  ;;  %v271_v17 = vadd.f32 %v1193_v15, %v1191_v14  ;;  %v1199_v18 = vld [vmem:[%s216_s28 + $0x70] sm:$0xff]  ;;  %v1203_v20 = vld [vmem:[%s216_s28 + $0x60] sm:$0xff]  ;;  %878 = vset.pattern.permute.xlu1 %v1015_v60  ;;  %s640_s22 = scalar_lea.sflag [#allocation4], %s1153_s23  ;;  %p1372_p11 = scmp.ne.s32.totalorder %s1369_s30, 0 }
  0x3d   : > { %v274_v16 = vadd.f32 %v1189_v13, %v1187_v12  ;;  %v1201_v19 = vld [vmem:[%s216_s28 + $0x78] sm:$0xff]  ;;  %v1205_v21 = vld [vmem:[%s216_s28 + $0x68] sm:$0xff]  ;;  %v292_v46 = vld [vmem:[%s1361_s1] sm:$0xf]  ;;  %s941_s28 = scalar_lea.vmem %s1312_s11, 2048  ;;  %s1016_s29 = smov [#allocation5]  }
  0x3e   : > { %v280_v22 = vadd.f32 %v1201_v19, %v1199_v18  ;;  %v277_v23 = vadd.f32 %v1205_v21, %v1203_v20  ;;  %v369_v47 = vld [vmem:[%s1363_s3] sm:$0xff]  ;;  %v370_v53 = vld [vmem:[%s1363_s3 + $0x8] sm:$0xff]  ;;  %v371_v54 = vld [vmem:[%s1363_s3 + $0x10] sm:$0xff]  ;;  %p942_p6 = scmp.ne.s32.totalorder %s1312_s11, %s941_s28  ;;  %s945_s12 = sshll.u32 %s1016_s29, 4  ;;  %s946_s12 = int_to_ptr.vmem [resolvable:$false] %s945_s12 }
  0x3f   : > { %269 = vadd.xlane.f32.xlu1 %v268_v10  ;;  %799 = vmatprep.mubr.msk.f32.mxu1 %vm385_vm2, %v369_v47  ;;  %v293_v48 = vld [vmem:[%s1362_s2] sm:$0xf]  ;;  %v372_v55 = vld [vmem:[%s1363_s3 + $0x18] sm:$0xff]  ;;  %v374_v57 = vld [vmem:[%s1363_s3 + $0x28] sm:$0xff]  ;;  %s947_s14 = scalar_lea.vmem %s946_s12, 4096  ;;  %p948_p8 = scmp.lt.s32.totalorder %s1312_s11, %s946_s12 }
  0x40   : > { %263 = vadd.xlane.f32.xlu0 %v262_v11  ;;  %v373_v56 = vld [vmem:[%s1363_s3 + $0x20] sm:$0xff]  ;;  %v375_v58 = vld [vmem:[%s1363_s3 + $0x30] sm:$0xff]  ;;  %v376_v59 = vld [vmem:[%s1363_s3 + $0x38] sm:$0xff]  ;;  %p943_p12 = pnand %p942_p6, %p1372_p11  ;;  %p949_p10 = scmp.lt.s32.totalorder %s947_s14, %s941_s28 }
  0x41   : > { %v378_v61 = vld [vmem:[%s1364_s4 + $0x8] sm:$0xff]  ;;  %v377_v62 = vld [vmem:[%s1364_s4] sm:$0xff]  ;;  %v380_v11 = vld [vmem:[%s1364_s4 + $0x18] sm:$0xff] }
  0x42   : > { %p944_p13 = pneg %p943_p12  ;;  %p950_p0 = por %p949_p10, %p948_p8 }
  0x43   : > { %275 = vadd.xlane.f32.xlu1 %v274_v16 }
  0x44   : > { %272 = vadd.xlane.f32.xlu0 %v271_v17  ;;  %v379_v17 = vld [vmem:[%s1364_s4 + $0x10] sm:$0xff]  ;;  %p951_p2 = pnand %p950_p0, %p944_p13 }
  0x47   : > { %281 = vadd.xlane.f32.xlu1 %v280_v22 }
  0x48   : > { %278 = vadd.xlane.f32.xlu0 %v277_v23 }
  0xc8   : > { %v267_v26 = vpop.xlane.xlu1 %266 }
  0xc9   : > { %v261_v27 = vpop.xlane.xlu0 %260  ;;  %v286_v32 = vmul.f32 0.00390625, %v267_v26 }
  0xca   : > { %v284_v30 = vmul.f32 0.00390625, %v261_v27  ;;  %v382_v27 = vld [vmem:[%s1364_s4 + $0x28] sm:$0xff] }
  0xcc   : > { %v270_v28 = vpop.xlane.xlu1 %269 }
  0xcd   : > { %v264_v29 = vpop.xlane.xlu0 %263  ;;  %v287_v33 = vmul.f32 0.00390625, %v270_v28 }
  0xce   : > { %v285_v31 = vmul.f32 0.00390625, %v264_v29  ;;  %v381_v29 = vld [vmem:[%s1364_s4 + $0x20] sm:$0xff] }
  0xcf   : > { %v815_v39 = vpack.c.bf16 %v287_v33, %v286_v32 }
  0xd0   : > { %v812_v34 = vpack.c.bf16 %v285_v31, %v284_v30  ;;  %v276_v35 = vpop.xlane.xlu1 %275 }
  0xd1   : > { %v273_v36 = vpop.xlane.xlu0 %272  ;;  %v289_v37 = vmul.f32 0.00390625, %v276_v35 }
  0xd2   : > { %813 = vmatpush3.bf16.msra.mxu0 %v812_v34  ;;  %v288_v38 = vmul.f32 0.00390625, %v273_v36  ;;  %v383_v36 = vld [vmem:[%s1364_s4 + $0x30] sm:$0xff] }
  0xd3   : > { %814 = vmatprep.subr.bf16.mxu0 %v1012_v24 }
  0xd4   : > { %v282_v40 = vpop.xlane.xlu1 %281  ;;  %v818_v42 = vpack.c.bf16 %v289_v37, %v288_v38 }
  0xd5   : > { %v279_v41 = vpop.xlane.xlu0 %278  ;;  %v291_v43 = vmul.f32 0.00390625, %v282_v40  ;;  %v384_v40 = vld [vmem:[%s1364_s4 + $0x38] sm:$0xff] }
  0xd6   : > { %816 = vmatpush3.bf16.msra.mxu0 %v815_v39  ;;  %v290_v44 = vmul.f32 0.00390625, %v279_v41 }
  0xd7   : > { %817 = vmatprep.subr.bf16.mxu0 %v1012_v24 }
  0xd8   : > { %v821_v45 = vpack.c.bf16 %v291_v43, %v290_v44 }
  0xda   : > { %819 = vmatpush3.bf16.msra.mxu0 %v818_v42 }
  0xdb   : > { %820 = vmatprep.subr.bf16.mxu0 %v1012_v24 }
  0xde   : > { %822 = vmatpush3.bf16.msra.mxu0 %v821_v45 }
  0xe1   : > { %795 = vmatmul.mubr.msk.f32.vlgmr.msra.gmra.mrb[0].mxu0 %vm294_vm1, %v292_v46 }
 0x1b4   : > { %v364_v49 = vpop.f32.mrb[0].mxu0 }
 0x1b5   : > { %v365_v50 = vadd.f32 %v364_v49, %v293_v48  ;;  %v796_v51 = vpop.f32.mrb[1].mxu0 }
 0x1b7   : > { %v368_v52 = vmax.f32 %v365_v50, 0.0 }
 0x1b9   : > { %797 = vmatprep.subr.msk.mxu1 %vm410_vm3, %v368_v52 }
 0x1ba   : > { %798 = vmatpush3.msk.msra.mxu1 %vm410_vm3, %v368_v52 }
 0x1bb   : > { %800 = vmatmul.mubr.msk.f32.vlgmr.msra.gmra.mrb[0].mxu1 %vm385_vm2, %v370_v53 }
 0x1bc   : > { %802 = vmatprep.mubr.msk.f32.mxu1 %vm385_vm2, %v371_v54 }
 0x1bf   : > { %803 = vmatmul.mubr.msk.f32.gmra.mrb[2].mxu1 %vm385_vm2, %v372_v55 }
 0x1c0   : > { %805 = vmatprep.mubr.msk.f32.mxu1 %vm385_vm2, %v373_v56 }
 0x1c3   : > { %806 = vmatmul.mubr.msk.f32.gmra.mrb[4].mxu1 %vm385_vm2, %v374_v57 }
 0x1c4   : > { %808 = vmatprep.mubr.msk.f32.mxu1 %vm385_vm2, %v375_v58 }
 0x1c7   : > { %809 = vmatmul.mubr.msk.f32.gmra.mrb[6].mxu1 %vm385_vm2, %v376_v59 }
 0x28e   : > { %v801_v63 = vpop.f32.mrb[0].mxu1 }
 0x28f   : > { %v486_v3 = vadd.f32 %v801_v63, %v378_v61  ;;  %v480_v7 = vpop.f32.mrb[1].mxu1 }
 0x290   : > { %v481_v10 = vadd.f32 %v480_v7, %v377_v62 }
 0x291   : > { %v746_v16 = vmul.f32 -1.442695, %v486_v3 }
 0x292   : > { %v745_v22 = vmul.f32 -1.442695, %v481_v10  ;;  %v804_v23 = vpop.f32.mrb[2].mxu1 }
 0x293   : > { %879 = vpow2.f32 %v746_v16  ;;  %v496_v24 = vadd.f32 %v804_v23, %v380_v11  ;;  %v490_v25 = vpop.f32.mrb[3].mxu1 }
 0x294   : > { %881 = vpow2.f32 %v745_v22  ;;  %v491_v26 = vadd.f32 %v490_v25, %v379_v17 }
 0x295   : > { %v748_v28 = vmul.f32 -1.442695, %v496_v24 }
 0x296   : > { %v747_v30 = vmul.f32 -1.442695, %v491_v26  ;;  %v807_v31 = vpop.f32.mrb[4].mxu1 }
 0x297   : > { %883 = vpow2.f32 %v748_v28  ;;  %v506_v32 = vadd.f32 %v807_v31, %v382_v27  ;;  %v500_v33 = vpop.f32.mrb[5].mxu1 }
 0x298   : > { %885 = vpow2.f32 %v747_v30  ;;  %v501_v34 = vadd.f32 %v500_v33, %v381_v29 }
 0x299   : > { %v750_v35 = vmul.f32 -1.442695, %v506_v32 }
 0x29a   : > { %v810_v37 = vpop.f32.mrb[6].mxu1  ;;  %v749_v38 = vmul.f32 -1.442695, %v501_v34 }
 0x29b   : > { %887 = vpow2.f32 %v750_v35  ;;  %v510_v39 = vpop.f32.mrb[7].mxu1  ;;  %v516_v47 = vadd.f32 %v810_v37, %v384_v40 }
 0x29c   : > { %v511_v41 = vadd.f32 %v510_v39, %v383_v36  ;;  %889 = vpow2.f32 %v749_v38 }
 0x29d   : > { %v880_v42 = vpop.eup %879  ;;  %v752_v51 = vmul.f32 -1.442695, %v516_v47 }
 0x29e   : > { %v882_v43 = vpop.eup %881  ;;  %v544_v44 = vadd.f32 1.0, %v880_v42  ;;  %v751_v45 = vmul.f32 -1.442695, %v511_v41 }
 0x29f   : > { %v543_v46 = vadd.f32 1.0, %v882_v43 }
 0x2a0   : > { %891 = vrcp.f32 %v544_v44 }
 0x2a1   : > { %v884_v48 = vpop.eup %883  ;;  %893 = vrcp.f32 %v543_v46 }
 0x2a2   : > { %v886_v49 = vpop.eup %885  ;;  %v546_v50 = vadd.f32 1.0, %v884_v48  ;;  %895 = vpow2.f32 %v751_v45 }
 0x2a3   : > { %v545_v52 = vadd.f32 1.0, %v886_v49 }
 0x2a4   : > { %897 = vrcp.f32 %v546_v50 }
 0x2a5   : > { %v888_v53 = vpop.eup %887  ;;  %899 = vpow2.f32 %v752_v51 }
 0x2a6   : > { %v548_v54 = vadd.f32 1.0, %v888_v53  ;;  %901 = vrcp.f32 %v545_v52  ;;  %v890_v55 = vpop.eup %889 }
 0x2a7   : > { %v547_v59 = vadd.f32 1.0, %v890_v55 }
 0x2a8   : > { %903 = vrcp.f32 %v548_v54 }
 0x2a9   : > { %905 = vrcp.f32 %v547_v59 }
 0x2aa   : > { %v892_v56 = vpop.eup %891 }
 0x2ab   : > { %v894_v57 = vpop.eup %893  ;;  %574 = vperm.xlu1 %878, %v892_v56  }
 0x2ac   : > { %v896_v58 = vpop.eup %895  ;;  %569 = vperm.xlu0 %877, %v894_v57  }
 0x2ad   : > { %v549_v61 = vadd.f32 1.0, %v896_v58 }
 0x2ae   : > { %v898_v60 = vpop.eup %897 }
 0x2af   : > { %584 = vperm.xlu1 %878, %v898_v60   ;;  %v900_v62 = vpop.eup %899  ;;  %907 = vrcp.f32 %v549_v61 }
 0x2b0   : > { %v902_v63 = vpop.eup %901  ;;  %v550_v7 = vadd.f32 1.0, %v900_v62 }
 0x2b2   : > { %v904_v3 = vpop.eup %903  ;;  %909 = vrcp.f32 %v550_v7 }
 0x2b3   : > { %579 = vperm.xlu1 %878, %v902_v63   ;;  %v906_v10 = vpop.eup %905 }
 0x2b7   : > { %594 = vperm.xlu1 %878, %v904_v3  }
 0x2b9   : > { %v908_v11 = vpop.eup %907 }
 0x2bb   : > { %589 = vperm.xlu1 %878, %v906_v10  }
 0x2bc   : > { %v910_v16 = vpop.eup %909 }
 0x2bf   : > { %599 = vperm.xlu1 %878, %v908_v11  }
 0x2c3   : > { %604 = vperm.xlu1 %878, %v910_v16  }
 0x32a   : > { %v575_v17 = vpop.permute.xlu1 %574 }
 0x32b   : > { %v609_v22 = vmul.f32 %v575_v17, %v1179_v8  ;;  %v610_v23 = vmul.f32 %v575_v17, %v1181_v9  ;;  %v570_v24 = vpop.permute.xlu0 %569 }
 0x32c   : > { %v607_v25 = vmul.f32 %v570_v24, %v1167_v2  ;;  %v608_v26 = vmul.f32 %v570_v24, %v1171_v4 }
 0x32d   : > { %625 = vst [vmem:[%s1279_s10 + $0x10] sm:$0xff] %v609_v22  ;;  %626 = vst [vmem:[%s1279_s10 + $0x18] sm:$0xff] %v610_v23 }
 0x32e   : > { %623 = vst [vmem:[%s1279_s10] sm:$0xff] %v607_v25  ;;  %624 = vst [vmem:[%s1279_s10 + $0x8] sm:$0xff] %v608_v26  ;;  %v585_v2 = vpop.permute.xlu1 %584 }
 0x32f   : > { %v613_v4 = vmul.f32 %v585_v2, %v1173_v5  ;;  %v614_v8 = vmul.f32 %v585_v2, %v1175_v6 }
 0x331   : > { %629 = vst [vmem:[%s1279_s10 + $0x30] sm:$0xff] %v613_v4  ;;  %630 = vst [vmem:[%s1279_s10 + $0x38] sm:$0xff] %v614_v8 }
 0x332   : > { %v580_v9 = vpop.permute.xlu1 %579 }
 0x333   : > { %v611_v27 = vmul.f32 %v580_v9, %v1163_v0  ;;  %v612_v28 = vmul.f32 %v580_v9, %v1165_v1 }
 0x335   : > { %627 = vst [vmem:[%s1279_s10 + $0x20] sm:$0xff] %v611_v27  ;;  %628 = vst [vmem:[%s1279_s10 + $0x28] sm:$0xff] %v612_v28 }
 0x336   : > { %v595_v29 = vpop.permute.xlu1 %594 }
 0x337   : > { %v617_v5 = vmul.f32 %v595_v29, %v1187_v12  ;;  %v618_v6 = vmul.f32 %v595_v29, %v1189_v13 }
 0x339   : > { %633 = vst [vmem:[%s1279_s10 + $0x50] sm:$0xff] %v617_v5  ;;  %634 = vst [vmem:[%s1279_s10 + $0x58] sm:$0xff] %v618_v6 }
 0x33a   : > { %v590_v30 = vpop.permute.xlu1 %589 }
 0x33b   : > { %v615_v31 = vmul.f32 %v590_v30, %v1191_v14  ;;  %v616_v0 = vmul.f32 %v590_v30, %v1193_v15 }
 0x33d   : > { %631 = vst [vmem:[%s1279_s10 + $0x40] sm:$0xff] %v615_v31  ;;  %632 = vst [vmem:[%s1279_s10 + $0x48] sm:$0xff] %v616_v0 }
 0x33e   : > { %v600_v1 = vpop.permute.xlu1 %599 }
 0x33f   : > { %v619_v32 = vmul.f32 %v600_v1, %v1203_v20  ;;  %v620_v12 = vmul.f32 %v600_v1, %v1205_v21 }
 0x341   : > { %635 = vst [vmem:[%s1279_s10 + $0x60] sm:$0xff] %v619_v32  ;;  %636 = vst [vmem:[%s1279_s10 + $0x68] sm:$0xff] %v620_v12 }
 0x342   : > { %v605_v13 = vpop.permute.xlu1 %604 }
 0x343   : > { %v621_v14 = vmul.f32 %v605_v13, %v1199_v18  ;;  %v622_v15 = vmul.f32 %v605_v13, %v1201_v19 }
 0x345   : > { %637 = vst [vmem:[%s1279_s10 + $0x70] sm:$0xff] %v621_v14  ;;  %638 = vst [vmem:[%s1279_s10 + $0x78] sm:$0xff] %v622_v15 }
 0x346   : > { %954 = shalt.err (!%p951_p2)
}
 0x347   : > { %s955_s15 = scalar_lea.hbm %s1310_s26, 2048  ;;  %s959_s7 = scalar_lea.hbm %s1365_s5, 4096 }
 0x348   : > { %p956_p4 = scmp.ne.s32.totalorder %s1310_s26, %s955_s15  ;;  %p960_p9 = scmp.lt.u32.totalorder %s1310_s26, %s1365_s5 }
 0x349   : > { %p961_p1 = scmp.lt.u32.totalorder %s959_s7, %s955_s15  ;;  %p963_p6 = scmp.lt.u32.totalorder %s955_s15, %s1310_s26 }
 0x34a   : > { %p957_p5 = pnand %p956_p4, %p1372_p11 }
 0x34b   : > { %p962_p3 = por %p961_p1, %p960_p9 }
 0x34c   : > { %p958_p7 = pneg %p957_p5 }
 0x34d   : > { %p964_p12 = por %p963_p6, %p962_p3 }
 0x34f   : > { %p965_p13 = pnand %p964_p12, %p958_p7 }
 0x351   : > { %968 = shalt.err (!%p965_p13)
}
 0x352   : > { %s1017_s25 = smov 256   ;;  %s1018_s13 = smov 16  }
 0x353   : > { %825 = dma.vmem_to_hbm [thread:$0]  (%p1372_p11), %s1312_s11, 2048, %s1310_s26, %s640_s22, %s1017_s25, %s1017_s25, %s1018_s13  }
 0x354 PF: > { %s668_s17 = sand.u32 1, %s995_s18   ;;  %p1373_p8 = scmp.ne.s32.totalorder %s1370_s6, 0 }
 0x355   : > { %p1374_p10 = scmp.ge.s32.totalorder %s1007_s21, 2  ;;  %s669_s28 = scalar_lea.sflag [#allocation4], %s668_s17 }
 0x357   : > { %p832_p0 = pnand %p1374_p10, %p1373_p8 }
 0x359   : > { %990 = dma.done.wait (!%p832_p0), %s669_s28, 2048  }
 0x35a   : > { %992 = vsyncadd (!%p832_p0), %s669_s28, 4294965248  ;;  %p18_p2 = scmp.ge.s32.totalorder %s1074_s24, 4   ;;  %s1375_s18 = smov %s999_s19 }
 0x35b   : > { %s1376_s19 = smov %s1003_s20  ;;  %s1377_s20 = smov %s1086_s27 }
 0x35c   : > { %s1378_s21 = smov %s1074_s24  ;;  %20 = sbr.rel (!%p18_p2) target bundleno = 5 (0x5), region = 85 }
 0x363   :  { %674 = vsyncpa [#allocation3], 1 }
 0x364   :  { %676 = vsyncpa [#allocation3 + $0x1], 1 }
 0x365   :  { %677 = vsyncpa [#allocation4], 1 }
 0x366   :  { %679 = vsyncpa [#allocation4 + $0x1], 1 }

</bundles_post_ra>
